<compile_context>
chip_gen: v7x
topology: tpu7x:2x2x1
jax: 0.10.0
libtpu: 0.0.40
codegen_flags: <defaults>
</compile_context>

<pallas_src>
import jax
import jax.numpy as jnp
from jax.experimental import pallas as pl
from jax.experimental.pallas import tpu as pltpu


def highway_kernel(x_ref, w_ref, b_ref, o_ref):
    # x_ref: (C, TL)   w_ref: (2C, C)   b_ref: (2C, 1)   o_ref: (C, TL)
    x = x_ref[...].astype(jnp.float32)
    c = x_ref.shape[0]
    # One fused MXU matmul for both the proj and transform convs.
    z = jnp.dot(w_ref[...], x, preferred_element_type=jnp.float32) + b_ref[...]
    proj = jnp.maximum(z[:c, :], 0.0)          # ReLU
    gate = jax.nn.sigmoid(z[c:, :])
    o_ref[...] = (gate * proj + (1.0 - gate) * x).astype(o_ref.dtype)


def _pick_l_tile(L: int) -> int:
    # Biggest lane-dense tile that evenly divides L. Even 4096 lanes x 32 ch
    # x 4 B = 512 KiB per buffer -- well inside every generation's VMEM
    # (including v7x's 64 MiB / ~32 MiB scoped).
    for cand in (4096, 2048, 1024, 512, 256, 128):
        if L % cand == 0:
            return cand
    return L  # small / irregular L: single full-extent block along L (legal)


def highway_forward(x_ncl, w_proj, b_proj, w_trans, b_trans, *, tl=None):
    """x_ncl: (N, C, L) like PyTorch Conv1d input.
    w_proj / w_trans: (C_out, C_in) -- Conv1d weight with the kernel dim squeezed."""
    N, C, L = x_ncl.shape
    if tl is None:
        tl = _pick_l_tile(L)
    assert L % tl == 0

    # Fuse the two convs' parameters (halves MXU pushes inside the kernel).
    w_fused = jnp.concatenate([w_proj, w_trans], axis=0)                   # (2C, C)
    b_fused = jnp.concatenate([b_proj, b_trans], axis=0).reshape(2 * C, 1)  # (2C, 1)

    grid = (N, L // tl)
    return pl.pallas_call(
        highway_kernel,
        out_shape=jax.ShapeDtypeStruct((N, C, L), x_ncl.dtype),
        grid_spec=pltpu.PrefetchScalarGridSpec(
            num_scalar_prefetch=0,
            grid=grid,
            in_specs=[
                # x tile: (C, tl); leading batch dim squeezed out of the kernel ref.
                pl.BlockSpec((None, C, tl), lambda n, l: (n, 0, l)),
                # Fused weight / bias: resident, same block every grid step.
                pl.BlockSpec((2 * C, C), lambda n, l: (0, 0)),
                pl.BlockSpec((2 * C, 1), lambda n, l: (0, 0)),
            ],
            out_specs=pl.BlockSpec((None, C, tl), lambda n, l: (n, 0, l)),
        ),
        compiler_params=pltpu.CompilerParams(
            dimension_semantics=("parallel", "parallel"),
        ),
    )(x_ncl, w_fused, b_fused)


if __name__ == "__main__":
    key = jax.random.PRNGKey(0)
    k_x, k_wp, k_bp, k_wt = jax.random.split(key, 4)

    N, C, L = 2, 32, 512  # input_size = 32
    x = jax.random.normal(k_x, (N, C, L), dtype=jnp.float32)

    # Deterministic parameter init (Conv1d weight shape (C, C, 1) -> squeezed).
    bound = 1.0 / jnp.sqrt(C)
    w_proj = jax.random.uniform(k_wp, (C, C), jnp.float32, -bound, bound)
    b_proj = jax.random.uniform(k_bp, (C,), jnp.float32, -bound, bound)
    w_trans = jax.random.uniform(k_wt, (C, C), jnp.float32, -bound, bound)
    b_trans = jnp.full((C,), -2.0, dtype=jnp.float32)  # transform.bias.fill_(-2.0)

    out = highway_forward(x, w_proj, b_proj, w_trans, b_trans)
    out = jax.block_until_ready(out)

    # Pure-JAX reference check of the hot path.
    proj_ref = jax.nn.relu(jnp.einsum("oc,ncl->nol", w_proj, x) + b_proj[None, :, None])
    gate_ref = jax.nn.sigmoid(jnp.einsum("oc,ncl->nol", w_trans, x) + b_trans[None, :, None])
    ref = gate_ref * proj_ref + (1.0 - gate_ref) * x
    assert out.shape == (N, C, L)
    assert jnp.allclose(out, ref, atol=1e-5, rtol=1e-5)

    print("KERNEL_OK")
</pallas_src>

<mosaic_0001>
module attributes {stable_mosaic.version = 11 : i64} {
  func.func @highway_kernel(%arg0: i32, %arg1: i32, %arg2: memref<1x32x512xf32, #tpu.memory_space<vmem>>, %arg3: memref<64x32xf32, #tpu.memory_space<vmem>>, %arg4: memref<64x1xf32, #tpu.memory_space<vmem>>, %arg5: memref<1x32x512xf32, #tpu.memory_space<vmem>>) attributes {dimension_semantics = [#tpu.dimension_semantics<parallel>, #tpu.dimension_semantics<parallel>], iteration_bounds = array<i64: 2, 1>, scalar_prefetch = 0 : i64, scratch_operands = 0 : i64, tpu.core_type = #tpu.core_type<tc>, window_params = [{transform_indices = @transform_0, window_bounds = array<i64: 1, 32, 512>}, {pipeline_mode = #tpu.pipeline_mode<synchronous>, transform_indices = @transform_1, window_bounds = array<i64: 64, 32>}, {pipeline_mode = #tpu.pipeline_mode<synchronous>, transform_indices = @transform_2, window_bounds = array<i64: 64, 1>}, {transform_indices = @transform_3, window_bounds = array<i64: 1, 32, 512>}]} {
    %c0 = arith.constant 0 : index
    %c0_0 = arith.constant 0 : index
    %c0_1 = arith.constant 0 : index
    %0 = vector.load %arg2[%c0, %c0_0, %c0_1] : memref<1x32x512xf32, #tpu.memory_space<vmem>>, vector<1x32x512xf32>
    %1 = vector.shape_cast %0 : vector<1x32x512xf32> to vector<32x512xf32>
    %c0_2 = arith.constant 0 : index
    %c0_3 = arith.constant 0 : index
    %2 = vector.load %arg3[%c0_2, %c0_3] : memref<64x32xf32, #tpu.memory_space<vmem>>, vector<64x32xf32>
    %cst = arith.constant dense<0.000000e+00> : vector<64x512xf32>
    %3 = tpu.matmul %2, %1, %cst {dimension_numbers = #tpu.dot_dimension_numbers<[1], [0], [0], [1], [0, 0, 1, 1], [], []>} : vector<64x32xf32>, vector<32x512xf32>, vector<64x512xf32> -> vector<64x512xf32>
    %c0_4 = arith.constant 0 : index
    %c0_5 = arith.constant 0 : index
    %4 = vector.load %arg4[%c0_4, %c0_5] : memref<64x1xf32, #tpu.memory_space<vmem>>, vector<64x1xf32>
    %5 = vector.broadcast %4 : vector<64x1xf32> to vector<64x512xf32>
    %6 = arith.addf %3, %5 : vector<64x512xf32>
    %7 = vector.extract_strided_slice %6 {offsets = [0, 0], sizes = [32, 512], strides = [1, 1]} : vector<64x512xf32> to vector<32x512xf32>
    %cst_6 = arith.constant 0.000000e+00 : f32
    %8 = vector.broadcast %cst_6 : f32 to vector<32x512xf32>
    %9 = arith.maximumf %7, %8 : vector<32x512xf32>
    %10 = vector.extract_strided_slice %6 {offsets = [32, 0], sizes = [32, 512], strides = [1, 1]} : vector<64x512xf32> to vector<32x512xf32>
    %11 = arith.negf %10 : vector<32x512xf32>
    %12 = math.exp %11 : vector<32x512xf32>
    %cst_7 = arith.constant 1.000000e+00 : f32
    %13 = vector.broadcast %cst_7 : f32 to vector<32x512xf32>
    %14 = arith.addf %13, %12 : vector<32x512xf32>
    %15 = arith.divf %13, %14 : vector<32x512xf32>
    %16 = arith.mulf %15, %9 : vector<32x512xf32>
    %cst_8 = arith.constant 1.000000e+00 : f32
    %17 = vector.broadcast %cst_8 : f32 to vector<32x512xf32>
    %18 = arith.subf %17, %15 : vector<32x512xf32>
    %19 = arith.mulf %18, %1 : vector<32x512xf32>
    %20 = arith.addf %16, %19 : vector<32x512xf32>
    %c0_9 = arith.constant 0 : index
    %c0_10 = arith.constant 0 : index
    %c0_11 = arith.constant 0 : index
    %21 = vector.load %arg5[%c0_9, %c0_10, %c0_11] : memref<1x32x512xf32, #tpu.memory_space<vmem>>, vector<1x32x512xf32>
    %22 = vector.shape_cast %21 : vector<1x32x512xf32> to vector<32x512xf32>
    %23 = vector.shape_cast %20 : vector<32x512xf32> to vector<1x32x512xf32>
    tpu.vector_store %arg5[%c0_9, %c0_10, %c0_11], %23 {strides = array<i32>} : memref<1x32x512xf32, #tpu.memory_space<vmem>>, vector<1x32x512xf32>,
    return
  }
  func.func @transform_0(%arg0: i32, %arg1: i32) -> (i32, i32, i32) {
    %c0_i32 = arith.constant 0 : i32
    %c0_i32_0 = arith.constant 0 : i32
    return %arg0, %c0_i32, %arg1 : i32, i32, i32
  }
  func.func @transform_1(%arg0: i32, %arg1: i32) -> (i32, i32) {
    %c0_i32 = arith.constant 0 : i32
    %c0_i32_0 = arith.constant 0 : i32
    %c0_i32_1 = arith.constant 0 : i32
    return %c0_i32, %c0_i32_0 : i32, i32
  }
  func.func @transform_2(%arg0: i32, %arg1: i32) -> (i32, i32) {
    %c0_i32 = arith.constant 0 : i32
    %c0_i32_0 = arith.constant 0 : i32
    %c0_i32_1 = arith.constant 0 : i32
    return %c0_i32, %c0_i32_0 : i32, i32
  }
  func.func @transform_3(%arg0: i32, %arg1: i32) -> (i32, i32, i32) {
    %c0_i32 = arith.constant 0 : i32
    %c0_i32_0 = arith.constant 0 : i32
    return %arg0, %c0_i32, %arg1 : i32, i32, i32
  }
}

</mosaic_0001>

<bundles_post_ra>
// kernel: tpu_custom_call.1
= control target key start
LH: loop header
LB: loop body
LE: loop exit
PB: predicated region body
PF: predicated region fallthrough
CT: control target
= control target key end

     0   :  { %8 = vsyncpa [#allocation3], 0  ;;  %s1652_s0 = inlined_call_operand.hbm [shape: f32[2,32,512], index: 0, kind: input, shape index: {}]   ;;  %s1653_s1 = inlined_call_operand.vmem [shape: f32[64,32], index: 1, kind: input, shape index: {}]   ;;  %s1654_s2 = inlined_call_operand.vmem [shape: f32[64,1], index: 2, kind: input, shape index: {}]   ;;  %s1655_s3 = inlined_call_operand.hbm [shape: f32[2,32,512], index: 3, kind: output, shape index: {}]  }
   0x1   :  { %10 = vsyncpa [#allocation3 + $0x1], 0 }
   0x2   :  { %11 = vsyncpa [#allocation4], 0 }
   0x3   :  { %13 = vsyncpa [#allocation4 + $0x1], 0  ;;  %s1168_s12 = smov 0   ;;  %s1170_s13 = smov 0  }
   0x4   :  { %s1172_s14 = smov 0   ;;  %s1174_s15 = smov 0  }
   0x5   :  { %s1176_s16 = smov 0   ;;  %s1178_s17 = smov 0  }
   0x6 LB: > { %s827_s18 = sadd.s32 4294967295, %s1138_s17   ;;  %s828_s19 = sadd.s32 4294967294, %s1138_s17   ;;  %s1138_s17 = sphi %s1178_s17, %s19_s17   ;;  %s1134_s16 = sphi %s1176_s16, %s1670_s16   ;;  %s1130_s15 = sphi %s1174_s15, %s1669_s15   ;;  %s1126_s14 = sphi %s1172_s14, %s1668_s14   ;;  %s1122_s13 = sphi %s1170_s13, %s1667_s13   ;;  %s1118_s12 = sphi %s1168_s12, %s1666_s12  }
   0x7   : > { %s31_s20 = sadd.s32 1, %s1134_s16  ;;  %s40_s21 = sadd.s32 1, %s1126_s14 }
   0x8   : > { %p33_p0 = scmp.ge.s32.totalorder %s31_s20, 2  ;;  %p47_p1 = scmp.ne.s32.totalorder %s1126_s14, %s1122_s13 }
   0x9   : > { %p48_p2 = scmp.eq.s32.totalorder %s1138_s17, 0  ;;  %p53_p3 = scmp.ne.s32.totalorder %s1122_s13, %s1118_s12 }
   0xa   : > { %s1672_s20 = smov (%p33_p0, %s31_s20), 0  ;;  %p54_p5 = scmp.eq.s32.totalorder %s827_s18, 0 }
   0xb   : > { %p1209_p4 = por %p48_p2, %p47_p1  ;;  %s35_s23 = ssub.s32 %s1134_s16, %s1672_s20 }
   0xc   : > { %p121_p6 = scmp.eq.s32.totalorder %s827_s18, 1  ;;  %p38_p7 = scmp.eq.s32.totalorder %s35_s23, 0 }
   0xd   : > { %p1215_p8 = por %p54_p5, %p53_p3  ;;  %p127_p10 = scmp.eq.s32.totalorder %s828_s19, 1 }
   0xe   : > { %p1219_p9 = por %p121_p6, %p47_p1  ;;  %p904_p13 = scmp.lt.s32.totalorder %s1138_s17, 2 }
   0xf   : > { %s1224_s26 = scalar_select %p38_p7, %s1126_s14, %s40_s21  }
  0x10   : > { %s1659_s25 = scalar_select %p1219_p9, 1, 0 }
  0x11   : > { %p1226_p11 = por %p127_p10, %p53_p3  ;;  %s153_s28 = sand.u32 1, %s1126_s14  }
  0x12   : > { %s831_s29 = sshll.u32 %s153_s28, 7  ;;  %s874_s30 = sshll.u32 %s1134_s16, 11 }
  0x13   : > { %s1660_s27 = scalar_select %p1226_p11, 1, 0 }
  0x14   : > { %s1237_s6 = scalar_lea.hbm %s1652_s0, %s874_s30  ;;  %s157_s7 = scalar_lea.vmem [#allocation2], %s831_s29 }
  0x15   : > { %s166_s8 = sshll.u32 %s157_s7, 4  ;;  %p1243_p0 = pnand %p904_p13, %p1209_p4  ;;  %s1239_s8 = int_to_ptr.vmem [resolvable:$true] %s166_s8 }
  0x16   : > { %s1248_s10 = scalar_lea.sflag [#allocation3], %s153_s28  ;;  %s1026_s11 = scalar_lea.hbm %s1237_s6, 2048 }
  0x17   : > { %p1027_p2 = scmp.ne.s32.totalorder %s1237_s6, %s1026_s11  ;;  %p1028_p3 = pneg %p1243_p0 }
  0x18   : > { %s1031_s21 = scalar_lea.hbm %s1652_s0, 4096  ;;  %p1032_p4 = scmp.lt.u32.totalorder %s1237_s6, %s1652_s0 }
  0x19   : > { %p1029_p5 = pnand %p1028_p3, %p1027_p2  ;;  %p1033_p7 = scmp.lt.u32.totalorder %s1031_s21, %s1026_s11 }
  0x1a   : > { %p1035_p13 = scmp.lt.u32.totalorder %s1026_s11, %s1237_s6 }
  0x1b   : > { %p1030_p6 = pneg %p1029_p5  ;;  %p1034_p10 = por %p1033_p7, %p1032_p4 }
  0x1d   : > { %p1036_p12 = por %p1035_p13, %p1034_p10 }
  0x1f   : > { %p1037_p1 = pnand %p1036_p12, %p1030_p6 }
  0x21   : > { %1040 = shalt.err (!%p1037_p1)
}
  0x22   : > { %s1041_s28 = scalar_lea.vmem %s1239_s8, 2048  ;;  %s1140_s29 = smov [#allocation2]  }
  0x23   : > { %p1042_p2 = scmp.ne.s32.totalorder %s1239_s8, %s1041_s28  ;;  %s1046_s30 = sshll.u32 %s1140_s29, 4  ;;  %s1047_s30 = int_to_ptr.vmem [resolvable:$false] %s1046_s30 }
  0x24   : > { %s1048_s4 = scalar_lea.vmem %s1047_s30, 4096  ;;  %p1049_p9 = scmp.lt.s32.totalorder %s1239_s8, %s1047_s30 }
  0x25   : > { %p1044_p5 = pnand %p1042_p2, %p1028_p3  ;;  %p1050_p4 = scmp.lt.s32.totalorder %s1048_s4, %s1041_s28 }
  0x27   : > { %p1045_p11 = pneg %p1044_p5  ;;  %p1051_p7 = por %p1050_p4, %p1049_p9 }
  0x29   : > { %p1052_p10 = pnand %p1051_p7, %p1045_p11 }
  0x2b   : > { %1055 = shalt.err (!%p1052_p10)
}
  0x2c   : > { %s1141_s5 = smov 512   ;;  %s1142_s7 = smov 32  }
  0x2d   : > { %899 = dma.hbm_to_vmem [thread:$0]  (!%p1243_p0), %s1237_s6, 2048, %s1239_s8, %s1248_s10, %s1141_s5, %s1141_s5, %s1142_s7  }
  0x2e   : > { %p174_p12 = scmp.lt.s32.totalorder %s1138_s17, 3  ;;  %p1662_p1 = scmp.ge.s32.totalorder %s1138_s17, 1 }
  0x30   : > { %p175_p3 = pnand %p1662_p1, %p174_p12 }
  0x31   : > { %s1280_s11 = sand.u32 (!%p175_p3), 1, %s1122_s13  }
  0x32   : > { %178 = sbr.rel (%p175_p3) target bundleno = 384 (0x180), region = 32  ;;  %s835_s18 = sshll.u32 (!%p175_p3), %s1280_s11, 7 }
  0x33   : > { %s181_s19 = scalar_lea.sflag (!%p175_p3), [#allocation3], %s1280_s11  ;;  %s1286_s21 = scalar_lea.vmem (!%p175_p3), [#allocation2], %s835_s18 }
  0x39   : > { %1109 = dma.done.wait (%p1215_p8), %s181_s19, 2048  }
  0x3a   : > { %1111 = vsyncadd (%p1215_p8), %s181_s19, 4294965248  ;;  %v1143_v0 = vmov 0.0   ;;  %v1144_v1 = vmov 0   ;;  %v1295_v2 = vld [vmem:[%s1286_s21 + $0x8] sm:$0xff]  ;;  %v1301_v4 = vld [vmem:[%s1286_s21 + $0x18] sm:$0xff]  ;;  %vm281_vm0 = vcmask 261120  }
  0x3b   : > { %370 = vmatprep.mubr.f32.mxu0 %v1143_v0  ;;  %483 = vmatprep.mubr.f32.mxu1 %v1143_v0  ;;  %v1298_v3 = vld [vmem:[%s1286_s21 + $0x28] sm:$0xff]  ;;  %v1306_v6 = vld [vmem:[%s1286_s21 + $0x38] sm:$0xff]  ;;  %v1309_v7 = vld [vmem:[%s1286_s21] sm:$0xff]  ;;  %s1545_s8 = scalar_lea.vmem [#allocation5], %s835_s18  ;;  %s875_s18 = sshll.u32 %s1130_s15, 11 }
  0x3c   : > { %960 = vset.pattern.permute.xlu0 %v1144_v1  ;;  %961 = vset.pattern.permute.xlu1 %v1144_v1  ;;  %v876_v5 = vpack.c.bf16 %v1298_v3, %v1295_v2  ;;  %v1312_v8 = vld [vmem:[%s1286_s21 + $0x20] sm:$0xff]  ;;  %v884_v9 = vpack.c.bf16 %v1306_v6, %v1301_v4  ;;  %v1319_v11 = vld [vmem:[%s1286_s21 + $0x10] sm:$0xff]  ;;  %v1325_v13 = vld [vmem:[%s1286_s21 + $0x48] sm:$0xff]  ;;  %s740_s9 = sshll.u32 %s1545_s8, 4  ;;  %s1600_s23 = scalar_lea.hbm %s1655_s3, %s875_s18  ;;  %s1602_s9 = int_to_ptr.vmem [resolvable:$true] %s740_s9 }
  0x3d   : > { %v878_v10 = vpack.c.bf16 %v1312_v8, %v1309_v7  ;;  %v1322_v12 = vld [vmem:[%s1286_s21 + $0x30] sm:$0xff]  ;;  %v1330_v15 = vld [vmem:[%s1286_s21 + $0x68] sm:$0xff]  ;;  %v1333_v16 = vld [vmem:[%s1286_s21 + $0x58] sm:$0xff]  ;;  %s725_s28 = scalar_lea.sflag [#allocation4], %s1280_s11  ;;  %s1056_s29 = scalar_lea.vmem %s1602_s9, 2048 }
  0x3e   : > { %877 = vmatprep.subr.bf16.mxu0 %v876_v5  ;;  %v886_v14 = vpack.c.bf16 %v1322_v12, %v1319_v11  ;;  %v1336_v17 = vld [vmem:[%s1286_s21 + $0x78] sm:$0xff]  ;;  %885 = vmatprep.subr.bf16.mxu1 %v884_v9  ;;  %v880_v18 = vpack.c.bf16 %v1330_v15, %v1325_v13  ;;  %v1343_v20 = vld [vmem:[%s1286_s21 + $0x40] sm:$0xff]  ;;  %v1349_v22 = vld [vmem:[%s1286_s21 + $0x50] sm:$0xff]  ;;  %p1057_p8 = scmp.ne.s32.totalorder %s1602_s9, %s1056_s29  ;;  %p1663_p9 = scmp.ne.s32.totalorder %s1659_s25, 0 }
  0x3f   : > { %879 = vmatpush1.bf16.msra.mxu0 %v878_v10  ;;  %v888_v19 = vpack.c.bf16 %v1336_v17, %v1333_v16  ;;  %v1346_v21 = vld [vmem:[%s1286_s21 + $0x60] sm:$0xff]  ;;  %v1354_v24 = vld [vmem:[%s1286_s21 + $0x70] sm:$0xff]  ;;  %v238_v29 = vld [vmem:[%s1654_s2 + $0x28] sm:$0xff]  ;;  %s1145_s15 = smov [#allocation5]  }
  0x40   : > { %887 = vmatpush1.bf16.msra.mxu1 %v886_v14  ;;  %v882_v23 = vpack.c.bf16 %v1346_v21, %v1343_v20  ;;  %881 = vmatprep.subr.bf16.mxu0 %v880_v18  ;;  %v890_v25 = vpack.c.bf16 %v1354_v24, %v1349_v22  ;;  %v225_v26 = vld [vmem:[%s1653_s1] sm:$0xff]  ;;  %v239_v28 = vld [vmem:[%s1654_s2 + $0x30] sm:$0xff]  ;;  %v240_v30 = vld [vmem:[%s1654_s2 + $0x38] sm:$0xff]  ;;  %p1058_p11 = pnand %p1057_p8, %p1663_p9  ;;  %s1060_s30 = sshll.u32 %s1145_s15, 4  ;;  %s1061_s30 = int_to_ptr.vmem [resolvable:$false] %s1060_s30 }
  0x41   : > { %889 = vmatprep.subr.bf16.mxu1 %v888_v19  ;;  %v237_v27 = vld [vmem:[%s1654_s2 + $0x20] sm:$0xff]  ;;  %273 = vperm.xlu1 %961, %v239_v28   ;;  %v226_v31 = vld [vmem:[%s1653_s1 + $0x8] sm:$0xff]  ;;  %v227_v34 = vld [vmem:[%s1653_s1 + $0x10] sm:$0xff]  ;;  %s1062_s4 = scalar_lea.vmem %s1061_s30, 4096  ;;  %p1063_p6 = scmp.lt.s32.totalorder %s1602_s9, %s1061_s30 }
  0x42   : > { %263 = vperm.xlu0 %960, %v237_v27   ;;  %v233_v32 = vld [vmem:[%s1654_s2] sm:$0xff]  ;;  %v234_v33 = vld [vmem:[%s1654_s2 + $0x8] sm:$0xff]  ;;  %v235_v35 = vld [vmem:[%s1654_s2 + $0x10] sm:$0xff]  ;;  %p1059_p0 = pneg %p1058_p11  ;;  %p1064_p13 = scmp.lt.s32.totalorder %s1062_s4, %s1056_s29 }
  0x43   : > { %883 = vmatpush1.bf16.msra.mxu0 %v882_v23  ;;  %v236_v36 = vld [vmem:[%s1654_s2 + $0x18] sm:$0xff]  ;;  %v229_v38 = vld [vmem:[%s1653_s1 + $0x20] sm:$0xff]  ;;  %v230_v39 = vld [vmem:[%s1653_s1 + $0x28] sm:$0xff] }
  0x44   : > { %891 = vmatpush1.bf16.msra.mxu1 %v890_v25  ;;  %v228_v37 = vld [vmem:[%s1653_s1 + $0x18] sm:$0xff]  ;;  %v231_v40 = vld [vmem:[%s1653_s1 + $0x30] sm:$0xff]  ;;  %p1065_p2 = por %p1064_p13, %p1063_p6 }
  0x45   : > { %278 = vperm.xlu1 %961, %v240_v30   ;;  %v232_v41 = vld [vmem:[%s1653_s1 + $0x38] sm:$0xff] }
  0x46   : > { %837 = vmatmul.mubr.msk.f32.vlgmr.msra.gmra.mrb[0].mxu0 %vm281_vm0, %v225_v26  ;;  %268 = vperm.xlu0 %960, %v238_v29   ;;  %p1066_p5 = pnand %p1065_p2, %p1059_p0 }
  0x47   : > { %845 = vmatmul.mubr.msk.f32.vlgmr.msra.gmra.mrb[0].mxu1 %vm281_vm0, %v225_v26  ;;  %376 = vmatprep.mubr.f32.mxu0 %v1143_v0 }
  0x48   : > { %489 = vmatprep.mubr.f32.mxu1 %v1143_v0 }
  0x49   : > { %248 = vperm.xlu1 %961, %v234_v33  }
  0x4a   : > { %838 = vmatmul.mubr.msk.f32.gmra.mrb[2].mxu0 %vm281_vm0, %v226_v31  ;;  %243 = vperm.xlu0 %960, %v233_v32  }
  0x4b   : > { %846 = vmatmul.mubr.msk.f32.gmra.mrb[2].mxu1 %vm281_vm0, %v226_v31  ;;  %382 = vmatprep.mubr.f32.mxu0 %v1143_v0 }
  0x4c   : > { %495 = vmatprep.mubr.f32.mxu1 %v1143_v0 }
  0x4d   : > { %258 = vperm.xlu1 %961, %v236_v36  }
  0x4e   : > { %839 = vmatmul.mubr.msk.f32.gmra.mrb[4].mxu0 %vm281_vm0, %v227_v34  ;;  %253 = vperm.xlu0 %960, %v235_v35  }
  0x4f   : > { %847 = vmatmul.mubr.msk.f32.gmra.mrb[4].mxu1 %vm281_vm0, %v227_v34  ;;  %388 = vmatprep.mubr.f32.mxu0 %v1143_v0 }
  0x50   : > { %501 = vmatprep.mubr.f32.mxu1 %v1143_v0 }
  0x52   : > { %840 = vmatmul.mubr.msk.f32.gmra.mrb[6].mxu0 %vm281_vm0, %v228_v37 }
  0x53   : > { %848 = vmatmul.mubr.msk.f32.gmra.mrb[6].mxu1 %vm281_vm0, %v228_v37  ;;  %394 = vmatprep.mubr.f32.mxu0 %v1143_v0 }
  0x54   : > { %507 = vmatprep.mubr.f32.mxu1 %v1143_v0 }
  0x56   : > { %841 = vmatmul.mubr.msk.f32.gmra.mrb[8].mxu0 %vm281_vm0, %v229_v38 }
  0x57   : > { %849 = vmatmul.mubr.msk.f32.gmra.mrb[8].mxu1 %vm281_vm0, %v229_v38  ;;  %400 = vmatprep.mubr.f32.mxu0 %v1143_v0 }
  0x58   : > { %513 = vmatprep.mubr.f32.mxu1 %v1143_v0 }
  0x5a   : > { %842 = vmatmul.mubr.msk.f32.gmra.mrb[10].mxu0 %vm281_vm0, %v230_v39 }
  0x5b   : > { %850 = vmatmul.mubr.msk.f32.gmra.mrb[10].mxu1 %vm281_vm0, %v230_v39  ;;  %406 = vmatprep.mubr.f32.mxu0 %v1143_v0 }
  0x5c   : > { %519 = vmatprep.mubr.f32.mxu1 %v1143_v0 }
  0x5e   : > { %843 = vmatmul.mubr.msk.f32.gmra.mrb[12].mxu0 %vm281_vm0, %v231_v40 }
  0x5f   : > { %851 = vmatmul.mubr.msk.f32.gmra.mrb[12].mxu1 %vm281_vm0, %v231_v40  ;;  %412 = vmatprep.mubr.f32.mxu0 %v1143_v0 }
  0x60   : > { %525 = vmatprep.mubr.f32.mxu1 %v1143_v0 }
  0x62   : > { %844 = vmatmul.mubr.msk.f32.gmra.mrb[14].mxu0 %vm281_vm0, %v232_v41 }
  0x63   : > { %852 = vmatmul.mubr.msk.f32.gmra.mrb[14].mxu1 %vm281_vm0, %v232_v41 }
  0xc0   : > { %v274_v59 = vpop.permute.xlu1 %273 }
  0xc1   : > { %v264_v57 = vpop.permute.xlu0 %263 }
  0xc4   : > { %v1468_v29 = vpop.permute.xlu1 %278 }
  0xc5   : > { %v269_v14 = vpop.permute.xlu0 %268 }
 0x119   : > { %v1436_v42 = vpop.f32.mrb[0].mxu0 }
 0x11a   : > { %v1438_v43 = vpop.f32.mrb[0].mxu1  ;;  %v1440_v44 = vpop.f32.mrb[1].mxu0 }
 0x11b   : > { %v1442_v45 = vpop.f32.mrb[1].mxu1 }
 0x11d   : > { %v1444_v46 = vpop.f32.mrb[2].mxu0 }
 0x11e   : > { %v1446_v47 = vpop.f32.mrb[2].mxu1  ;;  %v1448_v48 = vpop.f32.mrb[3].mxu0 }
 0x11f   : > { %v1450_v49 = vpop.f32.mrb[3].mxu1 }
 0x121   : > { %v1452_v50 = vpop.f32.mrb[4].mxu0 }
 0x122   : > { %v1454_v51 = vpop.f32.mrb[4].mxu1  ;;  %v1456_v52 = vpop.f32.mrb[5].mxu0 }
 0x123   : > { %v1458_v53 = vpop.f32.mrb[5].mxu1 }
 0x125   : > { %v1460_v54 = vpop.f32.mrb[6].mxu0 }
 0x126   : > { %v1462_v55 = vpop.f32.mrb[6].mxu1  ;;  %v1464_v56 = vpop.f32.mrb[7].mxu0 }
 0x127   : > { %v1466_v58 = vpop.f32.mrb[7].mxu1 }
 0x129   : > { %v396_v60 = vpop.f32.mrb[8].mxu0 }
 0x12a   : > { %v397_v61 = vadd.f32 %v396_v60, %v264_v57  ;;  %v509_v62 = vpop.f32.mrb[8].mxu1  ;;  %v398_v63 = vpop.f32.mrb[9].mxu0 }
 0x12b   : > { %v510_v0 = vadd.f32 %v509_v62, %v264_v57  ;;  %v399_v1 = vadd.f32 %v398_v63, %v264_v57  ;;  %v511_v5 = vpop.f32.mrb[9].mxu1 }
 0x12c   : > { %v853_v9 = vmul.f32 -1.442695, %v397_v61  ;;  %v512_v10 = vadd.f32 %v511_v5, %v264_v57  ;;  %v244_v57 = vpop.permute.xlu0 %243 }
 0x12d   : > { %v855_v18 = vmul.f32 -1.442695, %v510_v0  ;;  %v854_v19 = vmul.f32 -1.442695, %v399_v1  ;;  %v402_v23 = vpop.f32.mrb[10].mxu0  ;;  %v249_v1 = vpop.permute.xlu1 %248 }
 0x12e   : > { %962 = vpow2.f32 %v853_v9  ;;  %v856_v25 = vmul.f32 -1.442695, %v512_v10  ;;  %v403_v26 = vadd.f32 %v402_v23, %v269_v14  ;;  %v515_v27 = vpop.f32.mrb[10].mxu1  ;;  %v404_v28 = vpop.f32.mrb[11].mxu0 }
 0x12f   : > { %964 = vpow2.f32 %v855_v18  ;;  %v516_v30 = vadd.f32 %v515_v27, %v269_v14  ;;  %v405_v31 = vadd.f32 %v404_v28, %v269_v14  ;;  %v517_v32 = vpop.f32.mrb[11].mxu1  ;;  %v1478_v28 = vadd.f32 %v1440_v44, %v244_v57 }
 0x130   : > { %966 = vpow2.f32 %v854_v19  ;;  %v857_v33 = vmul.f32 -1.442695, %v403_v26  ;;  %v518_v34 = vadd.f32 %v517_v32, %v269_v14  ;;  %v1471_v14 = vadd.f32 %v1436_v42, %v244_v57 }
 0x131   : > { %968 = vpow2.f32 %v856_v25  ;;  %v859_v35 = vmul.f32 -1.442695, %v516_v30  ;;  %v858_v36 = vmul.f32 -1.442695, %v405_v31  ;;  %v408_v37 = vpop.f32.mrb[12].mxu0  ;;  %v1475_v26 = vadd.f32 %v1438_v43, %v244_v57 }
 0x132   : > { %970 = vpow2.f32 %v857_v33  ;;  %v860_v38 = vmul.f32 -1.442695, %v518_v34  ;;  %v409_v39 = vadd.f32 %v408_v37, %v274_v59  ;;  %v521_v40 = vpop.f32.mrb[12].mxu1  ;;  %v410_v41 = vpop.f32.mrb[13].mxu0  ;;  %v1481_v30 = vadd.f32 %v1442_v45, %v244_v57 }
 0x133   : > { %972 = vpow2.f32 %v859_v35  ;;  %v522_v60 = vadd.f32 %v521_v40, %v274_v59  ;;  %v411_v61 = vadd.f32 %v410_v41, %v274_v59  ;;  %v523_v62 = vpop.f32.mrb[13].mxu1  ;;  %v1484_v32 = vadd.f32 %v1444_v46, %v249_v1  ;;  %v254_v46 = vpop.permute.xlu0 %253 }
 0x134   : > { %974 = vpow2.f32 %v858_v36  ;;  %v861_v63 = vmul.f32 -1.442695, %v409_v39  ;;  %v524_v0 = vadd.f32 %v523_v62, %v274_v59  ;;  %v1487_v33 = vadd.f32 %v1446_v47, %v249_v1 }
 0x135   : > { %976 = vpow2.f32 %v860_v38  ;;  %v863_v5 = vmul.f32 -1.442695, %v522_v60  ;;  %v862_v9 = vmul.f32 -1.442695, %v411_v61  ;;  %v414_v10 = vpop.f32.mrb[14].mxu0  ;;  %v532_v35 = vmax.f32 %v1471_v14, 0.0 }
 0x136   : > { %978 = vpow2.f32 %v861_v63  ;;  %v864_v18 = vmul.f32 -1.442695, %v524_v0  ;;  %v415_v19 = vadd.f32 %v414_v10, %v1468_v29  ;;  %v527_v23 = vpop.f32.mrb[14].mxu1  ;;  %v416_v25 = vpop.f32.mrb[15].mxu0  ;;  %v1491_v44 = vadd.f32 %v1448_v48, %v249_v1 }
 0x137   : > { %980 = vpow2.f32 %v863_v5  ;;  %v529_v27 = vpop.f32.mrb[15].mxu1  ;;  %v534_v37 = vmax.f32 %v1475_v26, 0.0  ;;  %v1495_v38 = vadd.f32 %v1450_v49, %v249_v1  ;;  %v533_v40 = vmax.f32 %v1478_v28, 0.0 }
 0x138   : > { %v963_v59 = vpop.eup %962  ;;  %982 = vpow2.f32 %v862_v9  ;;  %v865_v42 = vmul.f32 -1.442695, %v415_v19  ;;  %v535_v41 = vmax.f32 %v1481_v30, 0.0  ;;  %v536_v60 = vmax.f32 %v1484_v32, 0.0 }
 0x139   : > { %v965_v31 = vpop.eup %964  ;;  %v596_v43 = vadd.f32 1.0, %v963_v59  ;;  %984 = vpow2.f32 %v864_v18  ;;  %v538_v61 = vmax.f32 %v1487_v33, 0.0  ;;  %v537_v49 = vmax.f32 %v1491_v44, 0.0  ;;  %v1509_v18 = vpop.permute.xlu1 %258 }
 0x13a   : > { %v967_v34 = vpop.eup %966  ;;  %v598_v36 = vadd.f32 1.0, %v965_v31  ;;  %986 = vpow2.f32 %v865_v42  ;;  %v1503_v0 = vadd.f32 %v1452_v50, %v254_v46  ;;  %v539_v9 = vmax.f32 %v1495_v38, 0.0 }
 0x13b   : > { %v969_v45 = vpop.eup %968  ;;  %988 = vrcp.f32 %v596_v43  ;;  %v597_v47 = vadd.f32 1.0, %v967_v34  ;;  %v1507_v10 = vadd.f32 %v1454_v51, %v254_v46  ;;  %v1512_v59 = vadd.f32 %v1456_v52, %v254_v46 }
 0x13c   : > { %v971_v39 = vpop.eup %970  ;;  %990 = vrcp.f32 %v598_v36  ;;  %v599_v57 = vadd.f32 1.0, %v969_v45  ;;  %v528_v50 = vadd.f32 %v527_v23, %v1468_v29  ;;  %v1516_v31 = vadd.f32 %v1458_v53, %v254_v46 }
 0x13d   : > { %v973_v48 = vpop.eup %972  ;;  %992 = vrcp.f32 %v597_v47  ;;  %v600_v62 = vadd.f32 1.0, %v971_v39  ;;  %v417_v51 = vadd.f32 %v416_v25, %v1468_v29  ;;  %v540_v36 = vmax.f32 %v1503_v0, 0.0 }
 0x13e   : > { %v975_v63 = vpop.eup %974  ;;  %994 = vrcp.f32 %v599_v57  ;;  %v602_v1 = vadd.f32 1.0, %v973_v48  ;;  %v1522_v45 = vadd.f32 %v1460_v54, %v1509_v18  ;;  %v542_v23 = vmax.f32 %v1507_v10, 0.0 }
 0x13f   : > { %v977_v5 = vpop.eup %976  ;;  %996 = vrcp.f32 %v600_v62  ;;  %v601_v19 = vadd.f32 1.0, %v975_v63  ;;  %v530_v53 = vadd.f32 %v529_v27, %v1468_v29  ;;  %v541_v57 = vmax.f32 %v1512_v59, 0.0 }
 0x140   : > { %v979_v26 = vpop.eup %978  ;;  %998 = vrcp.f32 %v602_v1  ;;  %v603_v28 = vadd.f32 1.0, %v977_v5  ;;  %v867_v48 = vmul.f32 -1.442695, %v528_v50  ;;  %v543_v63 = vmax.f32 %v1516_v31, 0.0 }
 0x141   : > { %v981_v42 = vpop.eup %980  ;;  %1000 = vrcp.f32 %v601_v19  ;;  %v604_v43 = vadd.f32 1.0, %v979_v26  ;;  %v866_v1 = vmul.f32 -1.442695, %v417_v51  ;;  %v544_v19 = vmax.f32 %v1522_v45, 0.0 }
 0x142   : > { %v983_v34 = vpop.eup %982  ;;  %1002 = vrcp.f32 %v603_v28  ;;  %v606_v52 = vadd.f32 1.0, %v981_v42 }
 0x143   : > { %v985_v47 = vpop.eup %984  ;;  %1004 = vrcp.f32 %v604_v43  ;;  %v605_v39 = vadd.f32 1.0, %v983_v34  ;;  %v1531_v43 = vmul.f32 -1.442695, %v530_v53 }
 0x144   : > { %v987_v46 = vpop.eup %986  ;;  %1006 = vrcp.f32 %v606_v52  ;;  %v607_v25 = vadd.f32 1.0, %v985_v47 }
 0x145   : > { %v989_v62 = vpop.eup %988  ;;  %1008 = vrcp.f32 %v605_v39  ;;  %v608_v54 = vadd.f32 1.0, %v987_v46 }
 0x146   : > { %v991_v5 = vpop.eup %990  ;;  %v644_v26 = vmul.f32 %v989_v62, %v532_v35  ;;  %v660_v28 = vsub.f32 1.0, %v989_v62  ;;  %1010 = vrcp.f32 %v607_v25 }
 0x147   : > { %v993_v29 = vpop.eup %992  ;;  %v646_v27 = vmul.f32 %v991_v5, %v534_v37  ;;  %v662_v42 = vsub.f32 1.0, %v991_v5  ;;  %1012 = vrcp.f32 %v608_v54 }
 0x148   : > { %v995_v50 = vpop.eup %994  ;;  %v676_v34 = vmul.f32 %v660_v28, %v1309_v7  ;;  %v645_v52 = vmul.f32 %v993_v29, %v533_v40  ;;  %v661_v47 = vsub.f32 1.0, %v993_v29  ;;  %1014 = vpow2.f32 %v867_v48 }
 0x149   : > { %v997_v51 = vpop.eup %996  ;;  %v678_v39 = vmul.f32 %v662_v42, %v1319_v11  ;;  %v647_v14 = vmul.f32 %v995_v50, %v535_v41  ;;  %v663_v35 = vsub.f32 1.0, %v995_v50  ;;  %1016 = vpow2.f32 %v866_v1 }
 0x14a   : > { %v999_v37 = vpop.eup %998  ;;  %v692_v46 = vadd.f32 %v676_v34, %v644_v26  ;;  %v677_v53 = vmul.f32 %v661_v47, %v1295_v2  ;;  %v648_v25 = vmul.f32 %v997_v51, %v536_v60  ;;  %v664_v7 = vsub.f32 1.0, %v997_v51 }
 0x14b   : > { %v1001_v40 = vpop.eup %1000  ;;  %v694_v62 = vadd.f32 %v678_v39, %v646_v27  ;;  %v679_v48 = vmul.f32 %v663_v35, %v1301_v4  ;;  %v650_v11 = vmul.f32 %v999_v37, %v538_v61  ;;  %v666_v54 = vsub.f32 1.0, %v999_v37 }
 0x14c   : > { %v1003_v30 = vpop.eup %1002  ;;  %708 = vst [vmem:[%s1545_s8] sm:$0xff] %v692_v46  ;;  %v693_v2 = vadd.f32 %v677_v53, %v645_v52  ;;  %v680_v32 = vmul.f32 %v664_v7, %v1312_v8  ;;  %v649_v41 = vmul.f32 %v1001_v40, %v537_v49  ;;  %v665_v4 = vsub.f32 1.0, %v1001_v40 }
 0x14d   : > { %v1005_v60 = vpop.eup %1004  ;;  %710 = vst [vmem:[%s1545_s8 + $0x10] sm:$0xff] %v694_v62  ;;  %v695_v33 = vadd.f32 %v679_v48, %v647_v14  ;;  %v682_v61 = vmul.f32 %v666_v54, %v1322_v12  ;;  %v651_v1 = vmul.f32 %v1003_v30, %v539_v9  ;;  %v667_v5 = vsub.f32 1.0, %v1003_v30 }
 0x14e   : > { %v1007_v26 = vpop.eup %1006  ;;  %709 = vst [vmem:[%s1545_s8 + $0x8] sm:$0xff] %v693_v2  ;;  %v696_v28 = vadd.f32 %v680_v32, %v648_v25  ;;  %v681_v8 = vmul.f32 %v665_v4, %v1298_v3  ;;  %v652_v44 = vmul.f32 %v1005_v60, %v540_v36  ;;  %v668_v49 = vsub.f32 1.0, %v1005_v60 }
 0x14f   : > { %v1009_v29 = vpop.eup %1008  ;;  %711 = vst [vmem:[%s1545_s8 + $0x18] sm:$0xff] %v695_v33  ;;  %v698_v27 = vadd.f32 %v682_v61, %v650_v11  ;;  %v683_v12 = vmul.f32 %v667_v5, %v1306_v6  ;;  %v654_v38 = vmul.f32 %v1007_v26, %v542_v23  ;;  %v670_v9 = vsub.f32 1.0, %v1007_v26 }
 0x150   : > { %v1011_v42 = vpop.eup %1010  ;;  %712 = vst [vmem:[%s1545_s8 + $0x20] sm:$0xff] %v696_v28  ;;  %v697_v50 = vadd.f32 %v681_v8, %v649_v41  ;;  %v684_v3 = vmul.f32 %v668_v49, %v1343_v20  ;;  %v653_v0 = vmul.f32 %v1009_v29, %v541_v57  ;;  %v669_v36 = vsub.f32 1.0, %v1009_v29 }
 0x151   : > { %v1013_v34 = vpop.eup %1012  ;;  %714 = vst [vmem:[%s1545_s8 + $0x30] sm:$0xff] %v698_v27  ;;  %v699_v52 = vadd.f32 %v683_v12, %v651_v1  ;;  %v686_v6 = vmul.f32 %v670_v9, %v1349_v22  ;;  %v655_v10 = vmul.f32 %v1011_v42, %v543_v63  ;;  %v671_v23 = vsub.f32 1.0, %v1011_v42 }
 0x152   : > { %v1015_v47 = vpop.eup %1014  ;;  %713 = vst [vmem:[%s1545_s8 + $0x28] sm:$0xff] %v697_v50  ;;  %v700_v51 = vadd.f32 %v684_v3, %v652_v44  ;;  %v685_v20 = vmul.f32 %v669_v36, %v1325_v13  ;;  %v656_v59 = vmul.f32 %v1013_v34, %v544_v19  ;;  %v672_v57 = vsub.f32 1.0, %v1013_v34 }
 0x153   : > { %v1017_v39 = vpop.eup %1016  ;;  %715 = vst [vmem:[%s1545_s8 + $0x38] sm:$0xff] %v699_v52  ;;  %v702_v22 = vadd.f32 %v686_v6, %v654_v38  ;;  %v687_v31 = vmul.f32 %v671_v23, %v1333_v16  ;;  %v610_v63 = vadd.f32 1.0, %v1015_v47  ;;  %1018 = vpow2.f32 %v1531_v43 }
 0x154   : > { %716 = vst [vmem:[%s1545_s8 + $0x40] sm:$0xff] %v700_v51  ;;  %v701_v14 = vadd.f32 %v685_v20, %v653_v0  ;;  %v688_v35 = vmul.f32 %v672_v57, %v1346_v21  ;;  %v609_v13 = vadd.f32 1.0, %v1017_v39  ;;  %v504_v37 = vadd.f32 %v1462_v55, %v1509_v18 }
 0x155   : > { %718 = vst [vmem:[%s1545_s8 + $0x50] sm:$0xff] %v702_v22  ;;  %v703_v45 = vadd.f32 %v687_v31, %v655_v10  ;;  %1020 = vrcp.f32 %v610_v63  ;;  %v393_v16 = vadd.f32 %v1464_v56, %v1509_v18  ;;  %v506_v30 = vadd.f32 %v1466_v58, %v1509_v18 }
 0x156   : > { %717 = vst [vmem:[%s1545_s8 + $0x48] sm:$0xff] %v701_v14  ;;  %v704_v19 = vadd.f32 %v688_v35, %v656_v59  ;;  %1022 = vrcp.f32 %v609_v13  ;;  %v546_v46 = vmax.f32 %v504_v37, 0.0 }
 0x157   : > { %719 = vst [vmem:[%s1545_s8 + $0x58] sm:$0xff] %v703_v45  ;;  %v545_v25 = vmax.f32 %v393_v16, 0.0  ;;  %v547_v32 = vmax.f32 %v506_v30, 0.0 }
 0x158   : > { %720 = vst [vmem:[%s1545_s8 + $0x60] sm:$0xff] %v704_v19 }
 0x15d   : > { %v1019_v43 = vpop.eup %1018 }
 0x15e   : > { %v611_v21 = vadd.f32 1.0, %v1019_v43 }
 0x15f   : > { %v1021_v53 = vpop.eup %1020 }
 0x160   : > { %v1023_v7 = vpop.eup %1022  ;;  %v658_v40 = vmul.f32 %v1021_v53, %v546_v46  ;;  %v674_v62 = vsub.f32 1.0, %v1021_v53  ;;  %1024 = vrcp.f32 %v611_v21 }
 0x161   : > { %v657_v48 = vmul.f32 %v1023_v7, %v545_v25  ;;  %v673_v11 = vsub.f32 1.0, %v1023_v7 }
 0x162   : > { %v690_v55 = vmul.f32 %v674_v62, %v1354_v24 }
 0x163   : > { %v689_v54 = vmul.f32 %v673_v11, %v1330_v15 }
 0x164   : > { %v706_v56 = vadd.f32 %v690_v55, %v658_v40 }
 0x165   : > { %v705_v2 = vadd.f32 %v689_v54, %v657_v48 }
 0x166   : > { %722 = vst [vmem:[%s1545_s8 + $0x70] sm:$0xff] %v706_v56 }
 0x167   : > { %721 = vst [vmem:[%s1545_s8 + $0x68] sm:$0xff] %v705_v2 }
 0x16a   : > { %v1025_v41 = vpop.eup %1024 }
 0x16b   : > { %v659_v4 = vmul.f32 %v1025_v41, %v547_v32  ;;  %v675_v60 = vsub.f32 1.0, %v1025_v41 }
 0x16d   : > { %v691_v24 = vmul.f32 %v675_v60, %v1336_v17 }
 0x16f   : > { %v707_v15 = vadd.f32 %v691_v24, %v659_v4 }
 0x171   : > { %723 = vst [vmem:[%s1545_s8 + $0x78] sm:$0xff] %v707_v15 }
 0x172   : > { %1069 = shalt.err (!%p1066_p5)
}
 0x173   : > { %s1070_s5 = scalar_lea.hbm %s1600_s23, 2048  ;;  %s1074_s21 = scalar_lea.hbm %s1655_s3, 4096 }
 0x174   : > { %p1071_p4 = scmp.ne.s32.totalorder %s1600_s23, %s1070_s5  ;;  %p1075_p12 = scmp.lt.u32.totalorder %s1600_s23, %s1655_s3 }
 0x175   : > { %p1076_p1 = scmp.lt.u32.totalorder %s1074_s21, %s1070_s5  ;;  %p1078_p8 = scmp.lt.u32.totalorder %s1070_s5, %s1600_s23 }
 0x176   : > { %p1072_p7 = pnand %p1071_p4, %p1663_p9 }
 0x177   : > { %p1077_p3 = por %p1076_p1, %p1075_p12 }
 0x178   : > { %p1073_p10 = pneg %p1072_p7 }
 0x179   : > { %p1079_p11 = por %p1078_p8, %p1077_p3 }
 0x17b   : > { %p1080_p0 = pnand %p1079_p11, %p1073_p10 }
 0x17d   : > { %1083 = shalt.err (!%p1080_p0)
}
 0x17e   : > { %s1146_s8 = smov 512   ;;  %s1147_s18 = smov 32  }
 0x17f   : > { %894 = dma.vmem_to_hbm [thread:$0]  (%p1663_p9), %s1602_s9, 2048, %s1600_s23, %s725_s28, %s1146_s8, %s1146_s8, %s1147_s18  }
 0x180 PF: > { %s755_s10 = sand.u32 1, %s1118_s12   ;;  %p1664_p6 = scmp.ne.s32.totalorder %s1660_s27, 0 }
 0x181   : > { %p1665_p13 = scmp.ge.s32.totalorder %s1138_s17, 2  ;;  %s756_s22 = scalar_lea.sflag [#allocation4], %s755_s10 }
 0x183   : > { %p901_p2 = pnand %p1665_p13, %p1664_p6 }
 0x185   : > { %1113 = dma.done.wait (!%p901_p2), %s756_s22, 2048  }
 0x186   : > { %1115 = vsyncadd (!%p901_p2), %s756_s22, 4294965248  ;;  %s19_s17 = sadd.s32 1, %s1138_s17   ;;  %s1666_s12 = smov %s1122_s13 }
 0x187   : > { %p16_p5 = scmp.ge.s32.totalorder %s19_s17, 4   ;;  %s1667_s13 = smov %s1126_s14 }
 0x188   : > { %s1668_s14 = smov %s1224_s26  ;;  %s1669_s15 = smov %s1134_s16 }
 0x189   : > { %s1670_s16 = smov %s1672_s20  ;;  %18 = sbr.rel (!%p16_p5) target bundleno = 6 (0x6), region = 77 }
 0x190   :  { %761 = vsyncpa [#allocation3], 1 }
 0x191   :  { %763 = vsyncpa [#allocation3 + $0x1], 1 }
 0x192   :  { %764 = vsyncpa [#allocation4], 1 }
 0x193   :  { %766 = vsyncpa [#allocation4 + $0x1], 1 }

</bundles_post_ra>
